<compile_context>
chip_gen: v6e
topology: v6e:2x2x1
jax: 0.10.0
libtpu: 0.0.40
codegen_flags: <defaults>
</compile_context>

<pallas_src>
import jax
import jax.numpy as jnp
from jax.experimental import pallas as pl
from jax.experimental.pallas import tpu as pltpu

EPS = 1e-5


def _make_kernel(B, N, in_ch, hidden, out_ch):
    BN = B * N
    h, o = hidden, out_ch
    inv_bn = 1.0 / BN

    def kernel(x_ref, adj_ref,
               wr1_ref, wo1_ref, wr2_ref, wo2_ref, wr3_ref, wo3_ref,
               wha_ref, whb_ref, whc_ref, vec_ref, out_ref):
        adj = adj_ref[...]                                   # (B, N, N)

        def layer(x2d, c_in, c_out, wr_ref, wo_ref, brow, grow, berow):
            # Adjacency aggregation stays 3-D (per-batch MXU matmul).
            x3d = x2d.reshape(B, N, c_in)
            agg = jnp.einsum('bij,bjc->bic', adj, x3d,
                             preferred_element_type=jnp.float32)
            agg2d = agg.reshape(BN, c_in)

            b_rel = vec_ref[brow:brow + 1, 0:c_out]          # (1, c_out)
            gamma = vec_ref[grow:grow + 1, 0:c_out]
            beta = vec_ref[berow:berow + 1, 0:c_out]

            # Flattened (B*N, C) weight matmuls, contraction-major weights.
            pre = (jnp.dot(agg2d, wr_ref[...], preferred_element_type=jnp.float32)
                   + jnp.dot(x2d, wo_ref[...], preferred_element_type=jnp.float32)
                   + b_rel)
            act = jnp.maximum(pre, 0.0)                      # ReLU, (BN, c_out)

            # Single-pass BN stats over the flattened (B*N) axis, then a
            # fused scale/shift (scale = g*rsqrt(var+eps), shift = b - m*scale).
            s1 = jnp.sum(act, axis=0, keepdims=True) * inv_bn          # mean
            s2 = jnp.sum(act * act, axis=0, keepdims=True) * inv_bn    # E[x^2]
            var = s2 - s1 * s1
            scale = gamma * jax.lax.rsqrt(var + EPS)
            shift = beta - s1 * scale
            return act * scale + shift

        x0 = x_ref[...].reshape(BN, in_ch)
        x1 = layer(x0, in_ch, h, wr1_ref, wo1_ref, 0, 1, 2)
        x2 = layer(x1, h, h, wr2_ref, wo2_ref, 3, 4, 5)
        x3 = layer(x2, h, o, wr3_ref, wo3_ref, 6, 7, 8)

        # Fused heads [lin1 | lin2]: concat replaced by split head weights.
        b_heads = vec_ref[9:10, 0:o + 1]                     # (1, o+1)
        heads = jnp.maximum(
            jnp.dot(x1, wha_ref[...], preferred_element_type=jnp.float32)
            + jnp.dot(x2, whb_ref[...], preferred_element_type=jnp.float32)
            + jnp.dot(x3, whc_ref[...], preferred_element_type=jnp.float32)
            + b_heads, 0.0)                                  # (BN, o+1)

        # Single lane-dense output slab: [x1 | x2 | x3 | s | val | pad].
        out_ref[...] = jnp.zeros_like(out_ref)
        out_ref[:, 0:h] = x1
        out_ref[:, h:2 * h] = x2
        out_ref[:, 2 * h:2 * h + o] = x3
        out_ref[:, 2 * h + o:2 * h + 2 * o + 1] = heads

    return kernel


def gnn_forward(x, adj, params):
    B, N, in_ch = x.shape
    hidden = params['w_rel1'].shape[0]
    out_ch = params['w_rel3'].shape[0]
    cat_ch = 2 * hidden + out_ch
    used_w = cat_ch + out_ch + 1                 # xcat | s | val
    out_w = ((used_w + 127) // 128) * 128        # lane-dense output width

    # Contraction-major (C_in, C_out) weights (transposed on the host — free).
    wr1, wo1 = params['w_rel1'].T, params['w_root1'].T
    wr2, wo2 = params['w_rel2'].T, params['w_root2'].T
    wr3, wo3 = params['w_rel3'].T, params['w_root3'].T

    # Fuse the two heads into one (cat_ch, out_ch+1) weight, then split along
    # the contraction dim so the kernel never materializes the concat.
    w_heads = jnp.concatenate([params['w_lin1'].T, params['w_lin2'].T], axis=1)
    wha = w_heads[:hidden]
    whb = w_heads[hidden:2 * hidden]
    whc = w_heads[2 * hidden:]
    b_heads = jnp.concatenate([params['b_lin1'], params['b_lin2']], axis=0)

    # Pack all small per-layer vectors into one padded slab.
    VW = max(hidden, out_ch + 1)

    def row(v):
        return jnp.pad(v, (0, VW - v.shape[0]))

    vecs = jnp.stack([
        row(params['b_rel1']), row(params['bn1_g']), row(params['bn1_b']),
        row(params['b_rel2']), row(params['bn2_g']), row(params['bn2_b']),
        row(params['b_rel3']), row(params['bn3_g']), row(params['bn3_b']),
        row(b_heads),
    ])

    args = (x, adj, wr1, wo1, wr2, wo2, wr3, wo3, wha, whb, whc, vecs)
    vmem_spec = pl.BlockSpec(memory_space=pltpu.MemorySpace.VMEM)

    out2d = pl.pallas_call(
        _make_kernel(B, N, in_ch, hidden, out_ch),
        out_shape=jax.ShapeDtypeStruct((B * N, out_w), jnp.float32),
        in_specs=[vmem_spec] * len(args),
        out_specs=vmem_spec,
        compiler_params=pltpu.CompilerParams(
            vmem_limit_bytes=32 * 1024 * 1024),
    )(*args)

    xcat = out2d[:, :cat_ch].reshape(B, N, cat_ch)
    s = out2d[:, cat_ch:cat_ch + out_ch].reshape(B, N, out_ch)
    val = out2d[:, cat_ch + out_ch:cat_ch + out_ch + 1].reshape(B, N, 1)
    return s, xcat, val


def reference_forward(x, adj, p):
    def conv(xx, wr, br, wo):
        agg = jnp.einsum('bij,bjc->bic', adj, xx)
        return (jnp.einsum('bnc,oc->bno', agg, wr) + br
                + jnp.einsum('bnc,oc->bno', xx, wo))

    def bn(xx, g, b):
        m = jnp.mean(xx, axis=(0, 1), keepdims=True)
        v = jnp.mean((xx - m) ** 2, axis=(0, 1), keepdims=True)
        return (xx - m) / jnp.sqrt(v + EPS) * g + b

    x1 = bn(jax.nn.relu(conv(x, p['w_rel1'], p['b_rel1'], p['w_root1'])), p['bn1_g'], p['bn1_b'])
    x2 = bn(jax.nn.relu(conv(x1, p['w_rel2'], p['b_rel2'], p['w_root2'])), p['bn2_g'], p['bn2_b'])
    x3 = bn(jax.nn.relu(conv(x2, p['w_rel3'], p['b_rel3'], p['w_root3'])), p['bn3_g'], p['bn3_b'])
    xc = jnp.concatenate([x1, x2, x3], axis=-1)
    s = jax.nn.relu(jnp.einsum('bnc,oc->bno', xc, p['w_lin1']) + p['b_lin1'])
    val = jax.nn.relu(jnp.einsum('bnc,oc->bno', xc, p['w_lin2']) + p['b_lin2'])
    return s, xc, val


def init_params(key, in_ch, hidden, out_ch):
    ks = jax.random.split(key, 16)
    cat_ch = 2 * hidden + out_ch
    f = jnp.float32
    p = {
        # conv1
        'w_rel1': jax.random.normal(ks[0], (hidden, in_ch), f) * 0.1,
        'b_rel1': jax.random.normal(ks[1], (hidden,), f) * 0.1,
        'w_root1': jax.random.normal(ks[2], (hidden, in_ch), f) * 0.1,
        'bn1_g': 1.0 + jax.random.normal(ks[3], (hidden,), f) * 0.1,
        'bn1_b': jax.random.normal(ks[4], (hidden,), f) * 0.1,
        # conv2
        'w_rel2': jax.random.normal(ks[5], (hidden, hidden), f) * 0.1,
        'b_rel2': jax.random.normal(ks[6], (hidden,), f) * 0.1,
        'w_root2': jax.random.normal(ks[7], (hidden, hidden), f) * 0.1,
        'bn2_g': 1.0 + jax.random.normal(ks[8], (hidden,), f) * 0.1,
        'bn2_b': jax.random.normal(ks[9], (hidden,), f) * 0.1,
        # conv3
        'w_rel3': jax.random.normal(ks[10], (out_ch, hidden), f) * 0.1,
        'b_rel3': jax.random.normal(ks[11], (out_ch,), f) * 0.1,
        'w_root3': jax.random.normal(ks[12], (out_ch, hidden), f) * 0.1,
        'bn3_g': 1.0 + jax.random.normal(ks[13], (out_ch,), f) * 0.1,
        'bn3_b': jax.random.normal(ks[14], (out_ch,), f) * 0.1,
        # heads
        'w_lin1': jax.random.normal(ks[15], (out_ch, cat_ch), f) * 0.1,
        'b_lin1': jnp.zeros((out_ch,), f) + 0.05,
        'w_lin2': jax.random.normal(ks[0], (1, cat_ch), f) * 0.1,
        'b_lin2': jnp.zeros((1,), f) + 0.05,
    }
    return p


if __name__ == "__main__":
    B, N = 2, 16
    in_ch, hidden, out_ch = 4, 32, 16

    key = jax.random.PRNGKey(0)
    kx, ka, kp = jax.random.split(key, 3)

    x = jax.random.normal(kx, (B, N, in_ch), jnp.float32)
    # symmetric-ish dense adjacency with self loops
    a = jax.random.uniform(ka, (B, N, N), jnp.float32)
    adj = (a > 0.5).astype(jnp.float32)
    adj = jnp.maximum(adj, jnp.transpose(adj, (0, 2, 1)))
    adj = jnp.maximum(adj, jnp.eye(N, dtype=jnp.float32)[None])

    params = init_params(kp, in_ch, hidden, out_ch)

    s, xcat, val = gnn_forward(x, adj, params)
    jax.block_until_ready((s, xcat, val))

    s_ref, xcat_ref, val_ref = reference_forward(x, adj, params)
    assert s.shape == (B, N, out_ch)
    assert xcat.shape == (B, N, 2 * hidden + out_ch)
    assert val.shape == (B, N, 1)
    assert jnp.allclose(s, s_ref, atol=1e-4, rtol=1e-4)
    assert jnp.allclose(xcat, xcat_ref, atol=1e-4, rtol=1e-4)
    assert jnp.allclose(val, val_ref, atol=1e-4, rtol=1e-4)

    print("KERNEL_OK")
</pallas_src>

<mosaic_0001>
module attributes {stable_mosaic.version = 11 : i64} {
  func.func @kernel(%arg0: memref<2x16x4xf32, #tpu.memory_space<vmem>>, %arg1: memref<2x16x16xf32, #tpu.memory_space<vmem>>, %arg2: memref<4x32xf32, #tpu.memory_space<vmem>>, %arg3: memref<4x32xf32, #tpu.memory_space<vmem>>, %arg4: memref<32x32xf32, #tpu.memory_space<vmem>>, %arg5: memref<32x32xf32, #tpu.memory_space<vmem>>, %arg6: memref<32x16xf32, #tpu.memory_space<vmem>>, %arg7: memref<32x16xf32, #tpu.memory_space<vmem>>, %arg8: memref<32x17xf32, #tpu.memory_space<vmem>>, %arg9: memref<32x17xf32, #tpu.memory_space<vmem>>, %arg10: memref<16x17xf32, #tpu.memory_space<vmem>>, %arg11: memref<10x32xf32, #tpu.memory_space<vmem>>, %arg12: memref<32x128xf32, #tpu.memory_space<vmem>>) attributes {dimension_semantics = [], scalar_prefetch = 0 : i64, scratch_operands = 0 : i64, tpu.core_type = #tpu.core_type<tc>} {
    %c0 = arith.constant 0 : index
    %c0_0 = arith.constant 0 : index
    %c0_1 = arith.constant 0 : index
    %0 = vector.load %arg1[%c0, %c0_0, %c0_1] : memref<2x16x16xf32, #tpu.memory_space<vmem>>, vector<2x16x16xf32>
    %c0_2 = arith.constant 0 : index
    %c0_3 = arith.constant 0 : index
    %c0_4 = arith.constant 0 : index
    %1 = vector.load %arg0[%c0_2, %c0_3, %c0_4] : memref<2x16x4xf32, #tpu.memory_space<vmem>>, vector<2x16x4xf32>
    %2 = vector.shape_cast %1 : vector<2x16x4xf32> to vector<32x4xf32>
    %3 = vector.shape_cast %2 : vector<32x4xf32> to vector<2x16x4xf32>
    "tpu.trace_start"() <{level = 10 : i32, message = "bij,bjc->bic"}> : () -> ()
    %cst = arith.constant dense<0.000000e+00> : vector<2x16x4xf32>
    %4 = tpu.matmul %0, %3, %cst {dimension_numbers = #tpu.dot_dimension_numbers<[2], [1], [1], [2], [0, 0, 0, 1, 1, 2], [0], [0]>} : vector<2x16x16xf32>, vector<2x16x4xf32>, vector<2x16x4xf32> -> vector<2x16x4xf32>
    "tpu.trace_stop"() : () -> ()
    %5 = vector.shape_cast %4 : vector<2x16x4xf32> to vector<32x4xf32>
    %c0_5 = arith.constant 0 : index
    %c0_6 = arith.constant 0 : index
    %6 = vector.load %arg11[%c0_5, %c0_6] : memref<10x32xf32, #tpu.memory_space<vmem>>, vector<1x32xf32>
    %c1 = arith.constant 1 : index
    %c0_7 = arith.constant 0 : index
    %7 = vector.load %arg11[%c1, %c0_7] : memref<10x32xf32, #tpu.memory_space<vmem>>, vector<1x32xf32>
    %c2 = arith.constant 2 : index
    %c0_8 = arith.constant 0 : index
    %8 = vector.load %arg11[%c2, %c0_8] : memref<10x32xf32, #tpu.memory_space<vmem>>, vector<1x32xf32>
    %c0_9 = arith.constant 0 : index
    %c0_10 = arith.constant 0 : index
    %9 = vector.load %arg2[%c0_9, %c0_10] : memref<4x32xf32, #tpu.memory_space<vmem>>, vector<4x32xf32>
    %cst_11 = arith.constant dense<0.000000e+00> : vector<32x32xf32>
    %10 = tpu.matmul %5, %9, %cst_11 {dimension_numbers = #tpu.dot_dimension_numbers<[1], [0], [0], [1], [0, 0, 1, 1], [], []>} : vector<32x4xf32>, vector<4x32xf32>, vector<32x32xf32> -> vector<32x32xf32>
    %c0_12 = arith.constant 0 : index
    %c0_13 = arith.constant 0 : index
    %11 = vector.load %arg3[%c0_12, %c0_13] : memref<4x32xf32, #tpu.memory_space<vmem>>, vector<4x32xf32>
    %cst_14 = arith.constant dense<0.000000e+00> : vector<32x32xf32>
    %12 = tpu.matmul %2, %11, %cst_14 {dimension_numbers = #tpu.dot_dimension_numbers<[1], [0], [0], [1], [0, 0, 1, 1], [], []>} : vector<32x4xf32>, vector<4x32xf32>, vector<32x32xf32> -> vector<32x32xf32>
    %13 = arith.addf %10, %12 : vector<32x32xf32>
    %14 = vector.broadcast %6 : vector<1x32xf32> to vector<32x32xf32>
    %15 = arith.addf %13, %14 : vector<32x32xf32>
    %cst_15 = arith.constant 0.000000e+00 : f32
    %16 = vector.broadcast %cst_15 : f32 to vector<32x32xf32>
    %17 = arith.maximumf %15, %16 : vector<32x32xf32>
    %cst_16 = arith.constant dense<0.000000e+00> : vector<32xf32>
    %18 = vector.multi_reduction <add>, %17, %cst_16 [0] : vector<32x32xf32> to vector<32xf32>
    %19 = vector.shape_cast %18 : vector<32xf32> to vector<1x32xf32>
    %cst_17 = arith.constant 3.125000e-02 : f32
    %20 = vector.broadcast %cst_17 : f32 to vector<1x32xf32>
    %21 = arith.mulf %19, %20 : vector<1x32xf32>
    %22 = arith.mulf %17, %17 : vector<32x32xf32>
    %cst_18 = arith.constant dense<0.000000e+00> : vector<32xf32>
    %23 = vector.multi_reduction <add>, %22, %cst_18 [0] : vector<32x32xf32> to vector<32xf32>
    %24 = vector.shape_cast %23 : vector<32xf32> to vector<1x32xf32>
    %cst_19 = arith.constant 3.125000e-02 : f32
    %25 = vector.broadcast %cst_19 : f32 to vector<1x32xf32>
    %26 = arith.mulf %24, %25 : vector<1x32xf32>
    %27 = arith.mulf %21, %21 : vector<1x32xf32>
    %28 = arith.subf %26, %27 : vector<1x32xf32>
    %cst_20 = arith.constant 9.99999974E-6 : f32
    %29 = vector.broadcast %cst_20 : f32 to vector<1x32xf32>
    %30 = arith.addf %28, %29 : vector<1x32xf32>
    %31 = math.rsqrt %30 : vector<1x32xf32>
    %32 = arith.mulf %7, %31 : vector<1x32xf32>
    %33 = arith.mulf %21, %32 : vector<1x32xf32>
    %34 = arith.subf %8, %33 : vector<1x32xf32>
    %35 = vector.broadcast %32 : vector<1x32xf32> to vector<32x32xf32>
    %36 = arith.mulf %17, %35 : vector<32x32xf32>
    %37 = vector.broadcast %34 : vector<1x32xf32> to vector<32x32xf32>
    %38 = arith.addf %36, %37 : vector<32x32xf32>
    %39 = vector.shape_cast %38 : vector<32x32xf32> to vector<2x16x32xf32>
    "tpu.trace_start"() <{level = 10 : i32, message = "bij,bjc->bic"}> : () -> ()
    %cst_21 = arith.constant dense<0.000000e+00> : vector<2x16x32xf32>
    %40 = tpu.matmul %0, %39, %cst_21 {dimension_numbers = #tpu.dot_dimension_numbers<[2], [1], [1], [2], [0, 0, 0, 1, 1, 2], [0], [0]>} : vector<2x16x16xf32>, vector<2x16x32xf32>, vector<2x16x32xf32> -> vector<2x16x32xf32>
    "tpu.trace_stop"() : () -> ()
    %41 = vector.shape_cast %40 : vector<2x16x32xf32> to vector<32x32xf32>
    %c3 = arith.constant 3 : index
    %c0_22 = arith.constant 0 : index
    %42 = vector.load %arg11[%c3, %c0_22] : memref<10x32xf32, #tpu.memory_space<vmem>>, vector<1x32xf32>
    %c4 = arith.constant 4 : index
    %c0_23 = arith.constant 0 : index
    %43 = vector.load %arg11[%c4, %c0_23] : memref<10x32xf32, #tpu.memory_space<vmem>>, vector<1x32xf32>
    %c5 = arith.constant 5 : index
    %c0_24 = arith.constant 0 : index
    %44 = vector.load %arg11[%c5, %c0_24] : memref<10x32xf32, #tpu.memory_space<vmem>>, vector<1x32xf32>
    %c0_25 = arith.constant 0 : index
    %c0_26 = arith.constant 0 : index
    %45 = vector.load %arg4[%c0_25, %c0_26] : memref<32x32xf32, #tpu.memory_space<vmem>>, vector<32x32xf32>
    %cst_27 = arith.constant dense<0.000000e+00> : vector<32x32xf32>
    %46 = tpu.matmul %41, %45, %cst_27 {dimension_numbers = #tpu.dot_dimension_numbers<[1], [0], [0], [1], [0, 0, 1, 1], [], []>} : vector<32x32xf32>, vector<32x32xf32>, vector<32x32xf32> -> vector<32x32xf32>
    %c0_28 = arith.constant 0 : index
    %c0_29 = arith.constant 0 : index
    %47 = vector.load %arg5[%c0_28, %c0_29] : memref<32x32xf32, #tpu.memory_space<vmem>>, vector<32x32xf32>
    %cst_30 = arith.constant dense<0.000000e+00> : vector<32x32xf32>
    %48 = tpu.matmul %38, %47, %cst_30 {dimension_numbers = #tpu.dot_dimension_numbers<[1], [0], [0], [1], [0, 0, 1, 1], [], []>} : vector<32x32xf32>, vector<32x32xf32>, vector<32x32xf32> -> vector<32x32xf32>
    %49 = arith.addf %46, %48 : vector<32x32xf32>
    %50 = vector.broadcast %42 : vector<1x32xf32> to vector<32x32xf32>
    %51 = arith.addf %49, %50 : vector<32x32xf32>
    %cst_31 = arith.constant 0.000000e+00 : f32
    %52 = vector.broadcast %cst_31 : f32 to vector<32x32xf32>
    %53 = arith.maximumf %51, %52 : vector<32x32xf32>
    %cst_32 = arith.constant dense<0.000000e+00> : vector<32xf32>
    %54 = vector.multi_reduction <add>, %53, %cst_32 [0] : vector<32x32xf32> to vector<32xf32>
    %55 = vector.shape_cast %54 : vector<32xf32> to vector<1x32xf32>
    %cst_33 = arith.constant 3.125000e-02 : f32
    %56 = vector.broadcast %cst_33 : f32 to vector<1x32xf32>
    %57 = arith.mulf %55, %56 : vector<1x32xf32>
    %58 = arith.mulf %53, %53 : vector<32x32xf32>
    %cst_34 = arith.constant dense<0.000000e+00> : vector<32xf32>
    %59 = vector.multi_reduction <add>, %58, %cst_34 [0] : vector<32x32xf32> to vector<32xf32>
    %60 = vector.shape_cast %59 : vector<32xf32> to vector<1x32xf32>
    %cst_35 = arith.constant 3.125000e-02 : f32
    %61 = vector.broadcast %cst_35 : f32 to vector<1x32xf32>
    %62 = arith.mulf %60, %61 : vector<1x32xf32>
    %63 = arith.mulf %57, %57 : vector<1x32xf32>
    %64 = arith.subf %62, %63 : vector<1x32xf32>
    %cst_36 = arith.constant 9.99999974E-6 : f32
    %65 = vector.broadcast %cst_36 : f32 to vector<1x32xf32>
    %66 = arith.addf %64, %65 : vector<1x32xf32>
    %67 = math.rsqrt %66 : vector<1x32xf32>
    %68 = arith.mulf %43, %67 : vector<1x32xf32>
    %69 = arith.mulf %57, %68 : vector<1x32xf32>
    %70 = arith.subf %44, %69 : vector<1x32xf32>
    %71 = vector.broadcast %68 : vector<1x32xf32> to vector<32x32xf32>
    %72 = arith.mulf %53, %71 : vector<32x32xf32>
    %73 = vector.broadcast %70 : vector<1x32xf32> to vector<32x32xf32>
    %74 = arith.addf %72, %73 : vector<32x32xf32>
    %75 = vector.shape_cast %74 : vector<32x32xf32> to vector<2x16x32xf32>
    "tpu.trace_start"() <{level = 10 : i32, message = "bij,bjc->bic"}> : () -> ()
    %cst_37 = arith.constant dense<0.000000e+00> : vector<2x16x32xf32>
    %76 = tpu.matmul %0, %75, %cst_37 {dimension_numbers = #tpu.dot_dimension_numbers<[2], [1], [1], [2], [0, 0, 0, 1, 1, 2], [0], [0]>} : vector<2x16x16xf32>, vector<2x16x32xf32>, vector<2x16x32xf32> -> vector<2x16x32xf32>
    "tpu.trace_stop"() : () -> ()
    %77 = vector.shape_cast %76 : vector<2x16x32xf32> to vector<32x32xf32>
    %c6 = arith.constant 6 : index
    %c0_38 = arith.constant 0 : index
    %78 = vector.load %arg11[%c6, %c0_38] : memref<10x32xf32, #tpu.memory_space<vmem>>, vector<1x16xf32>
    %c7 = arith.constant 7 : index
    %c0_39 = arith.constant 0 : index
    %79 = vector.load %arg11[%c7, %c0_39] : memref<10x32xf32, #tpu.memory_space<vmem>>, vector<1x16xf32>
    %c8 = arith.constant 8 : index
    %c0_40 = arith.constant 0 : index
    %80 = vector.load %arg11[%c8, %c0_40] : memref<10x32xf32, #tpu.memory_space<vmem>>, vector<1x16xf32>
    %c0_41 = arith.constant 0 : index
    %c0_42 = arith.constant 0 : index
    %81 = vector.load %arg6[%c0_41, %c0_42] : memref<32x16xf32, #tpu.memory_space<vmem>>, vector<32x16xf32>
    %cst_43 = arith.constant dense<0.000000e+00> : vector<32x16xf32>
    %82 = tpu.matmul %77, %81, %cst_43 {dimension_numbers = #tpu.dot_dimension_numbers<[1], [0], [0], [1], [0, 0, 1, 1], [], []>} : vector<32x32xf32>, vector<32x16xf32>, vector<32x16xf32> -> vector<32x16xf32>
    %c0_44 = arith.constant 0 : index
    %c0_45 = arith.constant 0 : index
    %83 = vector.load %arg7[%c0_44, %c0_45] : memref<32x16xf32, #tpu.memory_space<vmem>>, vector<32x16xf32>
    %cst_46 = arith.constant dense<0.000000e+00> : vector<32x16xf32>
    %84 = tpu.matmul %74, %83, %cst_46 {dimension_numbers = #tpu.dot_dimension_numbers<[1], [0], [0], [1], [0, 0, 1, 1], [], []>} : vector<32x32xf32>, vector<32x16xf32>, vector<32x16xf32> -> vector<32x16xf32>
    %85 = arith.addf %82, %84 : vector<32x16xf32>
    %86 = vector.broadcast %78 : vector<1x16xf32> to vector<32x16xf32>
    %87 = arith.addf %85, %86 : vector<32x16xf32>
    %cst_47 = arith.constant 0.000000e+00 : f32
    %88 = vector.broadcast %cst_47 : f32 to vector<32x16xf32>
    %89 = arith.maximumf %87, %88 : vector<32x16xf32>
    %cst_48 = arith.constant dense<0.000000e+00> : vector<16xf32>
    %90 = vector.multi_reduction <add>, %89, %cst_48 [0] : vector<32x16xf32> to vector<16xf32>
    %91 = vector.shape_cast %90 : vector<16xf32> to vector<1x16xf32>
    %cst_49 = arith.constant 3.125000e-02 : f32
    %92 = vector.broadcast %cst_49 : f32 to vector<1x16xf32>
    %93 = arith.mulf %91, %92 : vector<1x16xf32>
    %94 = arith.mulf %89, %89 : vector<32x16xf32>
    %cst_50 = arith.constant dense<0.000000e+00> : vector<16xf32>
    %95 = vector.multi_reduction <add>, %94, %cst_50 [0] : vector<32x16xf32> to vector<16xf32>
    %96 = vector.shape_cast %95 : vector<16xf32> to vector<1x16xf32>
    %cst_51 = arith.constant 3.125000e-02 : f32
    %97 = vector.broadcast %cst_51 : f32 to vector<1x16xf32>
    %98 = arith.mulf %96, %97 : vector<1x16xf32>
    %99 = arith.mulf %93, %93 : vector<1x16xf32>
    %100 = arith.subf %98, %99 : vector<1x16xf32>
    %cst_52 = arith.constant 9.99999974E-6 : f32
    %101 = vector.broadcast %cst_52 : f32 to vector<1x16xf32>
    %102 = arith.addf %100, %101 : vector<1x16xf32>
    %103 = math.rsqrt %102 : vector<1x16xf32>
    %104 = arith.mulf %79, %103 : vector<1x16xf32>
    %105 = arith.mulf %93, %104 : vector<1x16xf32>
    %106 = arith.subf %80, %105 : vector<1x16xf32>
    %107 = vector.broadcast %104 : vector<1x16xf32> to vector<32x16xf32>
    %108 = arith.mulf %89, %107 : vector<32x16xf32>
    %109 = vector.broadcast %106 : vector<1x16xf32> to vector<32x16xf32>
    %110 = arith.addf %108, %109 : vector<32x16xf32>
    %c9 = arith.constant 9 : index
    %c0_53 = arith.constant 0 : index
    %111 = vector.load %arg11[%c9, %c0_53] : memref<10x32xf32, #tpu.memory_space<vmem>>, vector<1x17xf32>
    %c0_54 = arith.constant 0 : index
    %c0_55 = arith.constant 0 : index
    %112 = vector.load %arg8[%c0_54, %c0_55] : memref<32x17xf32, #tpu.memory_space<vmem>>, vector<32x17xf32>
    %cst_56 = arith.constant dense<0.000000e+00> : vector<32x17xf32>
    %113 = tpu.matmul %38, %112, %cst_56 {dimension_numbers = #tpu.dot_dimension_numbers<[1], [0], [0], [1], [0, 0, 1, 1], [], []>} : vector<32x32xf32>, vector<32x17xf32>, vector<32x17xf32> -> vector<32x17xf32>
    %c0_57 = arith.constant 0 : index
    %c0_58 = arith.constant 0 : index
    %114 = vector.load %arg9[%c0_57, %c0_58] : memref<32x17xf32, #tpu.memory_space<vmem>>, vector<32x17xf32>
    %cst_59 = arith.constant dense<0.000000e+00> : vector<32x17xf32>
    %115 = tpu.matmul %74, %114, %cst_59 {dimension_numbers = #tpu.dot_dimension_numbers<[1], [0], [0], [1], [0, 0, 1, 1], [], []>} : vector<32x32xf32>, vector<32x17xf32>, vector<32x17xf32> -> vector<32x17xf32>
    %116 = arith.addf %113, %115 : vector<32x17xf32>
    %c0_60 = arith.constant 0 : index
    %c0_61 = arith.constant 0 : index
    %117 = vector.load %arg10[%c0_60, %c0_61] : memref<16x17xf32, #tpu.memory_space<vmem>>, vector<16x17xf32>
    %cst_62 = arith.constant dense<0.000000e+00> : vector<32x17xf32>
    %118 = tpu.matmul %110, %117, %cst_62 {dimension_numbers = #tpu.dot_dimension_numbers<[1], [0], [0], [1], [0, 0, 1, 1], [], []>} : vector<32x16xf32>, vector<16x17xf32>, vector<32x17xf32> -> vector<32x17xf32>
    %119 = arith.addf %116, %118 : vector<32x17xf32>
    %120 = vector.broadcast %111 : vector<1x17xf32> to vector<32x17xf32>
    %121 = arith.addf %119, %120 : vector<32x17xf32>
    %cst_63 = arith.constant 0.000000e+00 : f32
    %122 = vector.broadcast %cst_63 : f32 to vector<32x17xf32>
    %123 = arith.maximumf %121, %122 : vector<32x17xf32>
    %cst_64 = arith.constant 0.000000e+00 : f32
    %124 = vector.broadcast %cst_64 : f32 to vector<32x128xf32>
    %c0_65 = arith.constant 0 : index
    %c0_66 = arith.constant 0 : index
    %125 = vector.load %arg12[%c0_65, %c0_66] : memref<32x128xf32, #tpu.memory_space<vmem>>, vector<32x128xf32>
    tpu.vector_store %arg12[%c0_65, %c0_66], %124 {strides = array<i32>} : memref<32x128xf32, #tpu.memory_space<vmem>>, vector<32x128xf32>,
    %c0_67 = arith.constant 0 : index
    %c0_68 = arith.constant 0 : index
    %126 = vector.load %arg12[%c0_67, %c0_68] : memref<32x128xf32, #tpu.memory_space<vmem>>, vector<32x32xf32>
    tpu.vector_store %arg12[%c0_67, %c0_68], %38 {strides = array<i32>} : memref<32x128xf32, #tpu.memory_space<vmem>>, vector<32x32xf32>,
    %c0_69 = arith.constant 0 : index
    %c32 = arith.constant 32 : index
    %127 = vector.load %arg12[%c0_69, %c32] : memref<32x128xf32, #tpu.memory_space<vmem>>, vector<32x32xf32>
    tpu.vector_store %arg12[%c0_69, %c32], %74 {strides = array<i32>} : memref<32x128xf32, #tpu.memory_space<vmem>>, vector<32x32xf32>,
    %c0_70 = arith.constant 0 : index
    %c64 = arith.constant 64 : index
    %128 = vector.load %arg12[%c0_70, %c64] : memref<32x128xf32, #tpu.memory_space<vmem>>, vector<32x16xf32>
    tpu.vector_store %arg12[%c0_70, %c64], %110 {strides = array<i32>} : memref<32x128xf32, #tpu.memory_space<vmem>>, vector<32x16xf32>,
    %c0_71 = arith.constant 0 : index
    %c80 = arith.constant 80 : index
    %129 = vector.load %arg12[%c0_71, %c80] : memref<32x128xf32, #tpu.memory_space<vmem>>, vector<32x17xf32>
    tpu.vector_store %arg12[%c0_71, %c80], %123 {strides = array<i32>} : memref<32x128xf32, #tpu.memory_space<vmem>>, vector<32x17xf32>,
    return
  }
}

</mosaic_0001>

<bundles_post_ra>
// kernel: tpu_custom_call.1
= control target key start
LH: loop header
LB: loop body
LE: loop exit
PB: predicated region body
PF: predicated region fallthrough
CT: control target
= control target key end

     0   :  { %vm50_vm0 = vcmask 130048   ;;  %s2379_s0 = inlined_call_operand.vmem [shape: f32[2,16,4], index: 0, kind: input, shape index: {}]   ;;  %s2380_s1 = inlined_call_operand.vmem [shape: f32[2,16,16], index: 1, kind: input, shape index: {}]   ;;  %s2381_s2 = inlined_call_operand.vmem [shape: f32[4,32], index: 2, kind: input, shape index: {}]   ;;  %s2382_s3 = inlined_call_operand.vmem [shape: f32[4,32], index: 3, kind: input, shape index: {}]   ;;  %s2383_s4 = inlined_call_operand.vmem [shape: f32[32,32], index: 4, kind: input, shape index: {}]   ;;  %s2384_s5 = inlined_call_operand.vmem [shape: f32[32,32], index: 5, kind: input, shape index: {}]   ;;  %s2385_s6 = inlined_call_operand.vmem [shape: f32[32,16], index: 6, kind: input, shape index: {}]   ;;  %s2386_s7 = inlined_call_operand.vmem [shape: f32[32,16], index: 7, kind: input, shape index: {}]   ;;  %s2387_s8 = inlined_call_operand.vmem [shape: f32[32,17], index: 8, kind: input, shape index: {}]   ;;  %s2388_s9 = inlined_call_operand.vmem [shape: f32[32,17], index: 9, kind: input, shape index: {}]   ;;  %s2389_s10 = inlined_call_operand.vmem [shape: f32[16,17], index: 10, kind: input, shape index: {}]   ;;  %s2390_s11 = inlined_call_operand.vmem [shape: f32[10,32], index: 11, kind: input, shape index: {}]   ;;  %s2391_s12 = inlined_call_operand.hbm [shape: f32[32,128], index: 12, kind: output, shape index: {}]  }
   0x1   :  { %v47_v0 = vld [vmem:[%s2379_s0 + $0x8] sm:$0xff]  ;;  %v46_v1 = vld [vmem:[%s2379_s0] sm:$0xff]  ;;  %v49_v4 = vld [vmem:[%s2379_s0 + $0x18] sm:$0xff] }
   0x2   :  { %v2115_v2 = vld [vmem:[%s2380_s1] sm:$0xff]  ;;  %1847 = vmatprep.subr.mxu1 %v47_v0  ;;  %v2122_v3 = vld [vmem:[%s2380_s1 + $0x8] sm:$0xff] }
   0x3   :  { %1851 = vmatprep.mubr.msk.f32.mxu1 %vm50_vm0, %v2115_v2  ;;  %1848 = vmatpush3.msra.mxu1 %v47_v0 }
   0x4   :  { %17 = vsyncpa [#allocation3], 0  ;;  %1849 = vmatprep.subr.mxu1 %v46_v1  ;;  %v2130_v5 = vld [vmem:[%s2380_s1 + $0x10] sm:$0xff]  ;;  %v2142_v7 = vld [vmem:[%s2380_s1 + $0x18] sm:$0xff]  ;;  %vm231_vm1 = vcmask 1043456   ;;  %vm218_vm2 = vcmask 31744  }
   0x5   :  { %1850 = vmatpush3.msra.mxu1 %v46_v1  ;;  %v48_v6 = vld [vmem:[%s2379_s0 + $0x10] sm:$0xff]  ;;  %v217_v8 = vld [vmem:[%s2382_s3] sm:$0xf]  ;;  %1863 = vmatprep.mubr.msk.f32.mxu0 %vm218_vm2, %v46_v1  ;;  %v2034_v14 = vmov 0.0   ;;  %vm432_vm3 = vcmask 261120   ;;  %s2035_s23 = smov 32  }
   0x6   :  { %1852 = vmatmul.mubr.msk.f32.vlgmr.msra.gmra.mxu1 %vm50_vm0, %v2122_v3  ;;  %1854 = vmatprep.subr.mxu1 %v49_v4  ;;  %v216_v9 = vld [vmem:[%s2381_s2] sm:$0xf]  ;;  %1628 = vst [vmem:[#allocation2 + $0x10] sm:$0xff] %v2034_v14  ;;  %1626 = vst [vmem:[#allocation2] sm:$0xff] %v2034_v14  ;;  %vm1646_vm4 = vcmask 523520   ;;  %vm1663_vm5 = vcmask 654848  }
   0x7   :  { %1855 = vmatpush3.msra.mxu1 %v49_v4  ;;  %1858 = vmatprep.mubr.msk.f32.mxu1 %vm50_vm0, %v2130_v5  ;;  %1627 = vst [vmem:[#allocation2 + $0x8] sm:$0xff] %v2034_v14  ;;  %1629 = vst [vmem:[#allocation2 + $0x18] sm:$0xff] %v2034_v14  ;;  %v1719_v17 = vld [vmem:[%s2390_s11] ss:$0 sm:$0xff]  ;;  %vm1684_vm6 = vcmask 794240  }
   0x8   :  { %1856 = vmatprep.subr.mxu1 %v48_v6  ;;  %1861 = vmatprep.subr.msk.mxu0 %vm231_vm1, %v217_v8 }
   0x9   :  { %1857 = vmatpush3.msra.mxu1 %v48_v6  ;;  %1862 = vmatpush3.msk.msra.mxu0 %vm231_vm1, %v217_v8 }
   0xa   :  { %1859 = vmatmul.mubr.msk.f32.vlgmr.msra.gmra.mxu1 %vm50_vm0, %v2142_v7  ;;  %1864 = vmatmul.mubr.msk.f32.vlgmr.msra.gmra.mxu0 %vm218_vm2, %v47_v0 }
   0xb   :  { %1869 = vmatprep.subr.msk.mxu1 %vm231_vm1, %v216_v9  ;;  %1866 = vmatprep.mubr.msk.f32.mxu0 %vm218_vm2, %v48_v6 }
   0xc   :  { %1870 = vmatpush3.msk.msra.mxu1 %vm231_vm1, %v216_v9 }
   0xe   :  { %1867 = vmatmul.mubr.msk.f32.gmra.mxu0 %vm218_vm2, %v49_v4 }
   0xf   :  { %1881 = vmatprep.mubr.msk.f32.mxu0 %vm50_vm0, %v2115_v2 }
  0xc6   :  { %v1853_v10 = vpop.f32.mrf.mxu1 }
  0xc8   :  { %v123_v11 = vpop.f32.mrf.mxu1 }
  0xc9   :  { %1871 = vmatprep.mubr.msk.f32.mxu1 %vm218_vm2, %v123_v11  ;;  %v472_v11 = vlaneseq }
  0xca   :  { %v1860_v12 = vpop.f32.mrf.mxu1  ;;  %1872 = vmatmul.mubr.msk.f32.vlgmr.msra.gmra.mxu1 %vm218_vm2, %v1853_v10  ;;  %v1865_v15 = vpop.f32.mrf.mxu0 }
  0xcc   :  { %v204_v13 = vpop.f32.mrf.mxu1  ;;  %v301_v16 = vpop.f32.mrf.mxu0 }
  0xcd   :  { %1874 = vmatprep.mubr.msk.f32.mxu1 %vm218_vm2, %v204_v13  ;;  %v214_v13 = vld [vmem:[%s2390_s11 + $0x1] sm:$0x1] }
  0xce   :  { %1875 = vmatmul.mubr.msk.f32.gmra.mxu1 %vm218_vm2, %v1860_v12  ;;  %v1868_v22 = vpop.f32.mrf.mxu0  ;;  %v473_v12 = vshrl.u32 %v472_v11, 7 }
  0xcf   :  { %1888 = vmatprep.mubr.msk.f32.mxu1 %vm50_vm0, %v2130_v5 }
  0xd0   :  { %v311_v30 = vpop.f32.mrf.mxu0  ;;  %v2178_v14 = vsub.s32 0, %v473_v12 }
 0x18a   :  { %v1873_v18 = vpop.f32.mrf.mxu1 }
 0x18b   :  { %v407_v19 = vadd.f32 %v1873_v18, %v1865_v15 }
 0x18c   :  { %v401_v20 = vpop.f32.mrf.mxu1 }
 0x18d   :  { %v425_v21 = vadd.f32 %v1719_v17, %v407_v19  ;;  %v402_v23 = vadd.f32 %v401_v20, %v301_v16 }
 0x18e   :  { %v1876_v24 = vpop.f32.mrf.mxu1 }
 0x18f   :  { %v424_v25 = vadd.f32 %v1719_v17, %v402_v23  ;;  %v417_v26 = vadd.f32 %v1876_v24, %v1868_v22  ;;  %v429_v27 = vmax.f32 %v425_v21, 0.0 }
 0x190   :  { %v411_v28 = vpop.f32.mrf.mxu1 }
 0x191   :  { %v428_v29 = vmax.f32 %v424_v25, 0.0  ;;  %v427_v31 = vadd.f32 %v1719_v17, %v417_v26  ;;  %v412_v32 = vadd.f32 %v411_v28, %v311_v30  ;;  %v448_v34 = vmul.f32 %v429_v27, %v429_v27 }
 0x192   :  { %v434_v38 = vsel %vm432_vm3, %v429_v27, 0.0 }
 0x193   :  { %v447_v33 = vmul.f32 %v428_v29, %v428_v29  ;;  %v433_v35 = vsel %vm432_vm3, %v428_v29, 0.0  ;;  %v431_v36 = vmax.f32 %v427_v31, 0.0  ;;  %v426_v37 = vadd.f32 %v1719_v17, %v412_v32  ;;  %v215_v17 = vld [vmem:[%s2390_s11 + $0x2] sm:$0x1]  ;;  %v644_v32 = vld [vmem:[%s2383_s4 + $0x18] sm:$0xff] }
 0x194   :  { %v435_v41 = vadd.f32 %v434_v38, %v433_v35  ;;  %v452_v42 = vsel %vm432_vm3, %v448_v34, 0.0  ;;  %v643_v34 = vld [vmem:[%s2383_s4 + $0x10] sm:$0xff]  ;;  %v645_v35 = vld [vmem:[%s2384_s5] sm:$0xff] }
 0x195   :  { %v451_v39 = vsel %vm432_vm3, %v447_v33, 0.0  ;;  %v430_v40 = vmax.f32 %v426_v37, 0.0  ;;  %v450_v43 = vmul.f32 %v431_v36, %v431_v36  ;;  %v438_v48 = vsel %vm432_vm3, %v431_v36, 0.0  ;;  %v646_v33 = vld [vmem:[%s2384_s5 + $0x8] sm:$0xff]  ;;  %v641_v37 = vld [vmem:[%s2383_s4] sm:$0xff] }
 0x196   :  { %v453_v46 = vadd.f32 %v452_v42, %v451_v39 }
 0x197   :  { %v436_v44 = vsel %vm432_vm3, %v430_v40, 0.0  ;;  %v449_v45 = vmul.f32 %v430_v40, %v430_v40  ;;  %v456_v52 = vsel %vm432_vm3, %v450_v43, 0.0  ;;  %v1732_v43 = vld [vmem:[%s2390_s11 + $0x3] ss:$0 sm:$0xff] }
 0x198   :  { %v437_v47 = vadd.f32 %v436_v44, %v435_v41 }
 0x199   :  { %v454_v49 = vsel %vm432_vm3, %v449_v45, 0.0 }
 0x19a   :  { %v439_v50 = vadd.f32 %v438_v48, %v437_v47  ;;  %v455_v51 = vadd.f32 %v454_v49, %v453_v46 }
 0x19c   :  { %v440_v53 = vrot.slane %v439_v50, 4  ;;  %v457_v54 = vadd.f32 %v456_v52, %v455_v51 }
 0x19e   :  { %v441_v55 = vadd.f32 %v440_v53, %v439_v50  ;;  %v458_v56 = vrot.slane %v457_v54, 4 }
 0x1a0   :  { %v442_v57 = vrot.slane %v441_v55, 2  ;;  %v459_v58 = vadd.f32 %v458_v56, %v457_v54 }
 0x1a2   :  { %v443_v59 = vadd.f32 %v442_v57, %v441_v55  ;;  %v460_v60 = vrot.slane %v459_v58, 2 }
 0x1a4   :  { %v444_v61 = vrot.slane %v443_v59, 1  ;;  %v461_v62 = vadd.f32 %v460_v60, %v459_v58 }
 0x1a6   :  { %v445_v63 = vadd.f32 %v444_v61, %v443_v59  ;;  %v462_v0 = vrot.slane %v461_v62, 1 }
 0x1a8   :  { %v446_v1 = vmul.f32 0.03125, %v445_v63  ;;  %v463_v4 = vadd.f32 %v462_v0, %v461_v62 }
 0x1aa   :  { %v464_v6 = vmul.f32 0.03125, %v463_v4  ;;  %v465_v8 = vmul.f32 %v446_v1, %v446_v1 }
 0x1ac   :  { %v466_v9 = vsub.f32 %v464_v6, %v465_v8 }
 0x1ae   :  { %v467_v10 = vadd.f32 1e-05, %v466_v9 }
 0x1b0   :  { %2006 = vrsqrt.f32 %v467_v10 }
 0x1bd   :  { %v2007_v15 = vpop.eup %2006 }
 0x1be   :  { %v469_v16 = vmul.f32 %v2007_v15, %v214_v13 }
 0x1c0   :  { %v470_v18 = vmul.f32 %v469_v16, %v446_v1  ;;  %v475_v19 = vrot.slane %v469_v16, %v2178_v14 }
 0x1c2   :  { %v471_v20 = vsub.f32 %v215_v17, %v470_v18  ;;  %v478_v21 = vmul.f32 %v475_v19, %v430_v40  ;;  %v477_v23 = vmul.f32 %v475_v19, %v429_v27  ;;  %v479_v24 = vmul.f32 %v475_v19, %v431_v36  ;;  %v648_v27 = vld [vmem:[%s2384_s5 + $0x18] sm:$0xff]  ;;  %v642_v36 = vld [vmem:[%s2383_s4 + $0x8] sm:$0xff] }
 0x1c3   :  { %v476_v25 = vmul.f32 %v475_v19, %v428_v29  ;;  %v647_v29 = vld [vmem:[%s2384_s5 + $0x10] sm:$0xff]  ;;  %s2036_s5 = smov 64  }
 0x1c4   :  { %v483_v22 = vrot.slane %v471_v20, %v2178_v14 }
 0x1c6   :  { %v2185_v26 = vadd.f32 %v483_v22, %v478_v21  ;;  %v2187_v28 = vadd.f32 %v483_v22, %v477_v23  ;;  %v2189_v30 = vadd.f32 %v483_v22, %v479_v24  ;;  %v2191_v31 = vadd.f32 %v483_v22, %v476_v25 }
 0x1c8   :  { %1877 = vmatprep.subr.mxu0 %v2187_v28  ;;  %1884 = vmatprep.subr.mxu1 %v2189_v30  ;;  %1632 = vst.msk [vmem:[#allocation2 + $0x10] sm:$0xff] %vm432_vm3, %v2185_v26  ;;  %1630 = vst.msk [vmem:[#allocation2] sm:$0xff] %vm432_vm3, %v2191_v31 }
 0x1c9   :  { %1631 = vst.msk [vmem:[#allocation2 + $0x8] sm:$0xff] %vm432_vm3, %v2187_v28  ;;  %1633 = vst.msk [vmem:[#allocation2 + $0x18] sm:$0xff] %vm432_vm3, %v2189_v30  ;;  %1878 = vmatpush3.msra.mxu0 %v2187_v28  ;;  %1885 = vmatpush3.msra.mxu1 %v2189_v30 }
 0x1ca   :  { %1879 = vmatprep.subr.mxu0 %v2191_v31  ;;  %1886 = vmatprep.subr.mxu1 %v2185_v26 }
 0x1cb   :  { %1880 = vmatpush3.msra.mxu0 %v2191_v31  ;;  %1887 = vmatpush3.msra.mxu1 %v2185_v26 }
 0x1cc   :  { %1882 = vmatmul.mubr.msk.f32.vlgmr.msra.gmra.mxu0 %vm50_vm0, %v2122_v3  ;;  %1891 = vmatprep.subr.mxu0 %v648_v27 }
 0x1cd   :  { %1892 = vmatpush3.msra.mxu0 %v648_v27  ;;  %1899 = vmatprep.mubr.msk.f32.mxu0 %vm432_vm3, %v2191_v31 }
 0x1ce   :  { %1889 = vmatmul.mubr.msk.f32.vlgmr.msra.gmra.mxu1 %vm50_vm0, %v2142_v7  ;;  %1893 = vmatprep.subr.mxu0 %v647_v29 }
 0x1cf   :  { %1894 = vmatpush3.msra.mxu0 %v647_v29  ;;  %1905 = vmatprep.subr.mxu1 %v644_v32 }
 0x1d0   :  { %1895 = vmatprep.subr.mxu0 %v646_v33  ;;  %1906 = vmatpush3.msra.mxu1 %v644_v32 }
 0x1d1   :  { %1896 = vmatpush3.msra.mxu0 %v646_v33  ;;  %1907 = vmatprep.subr.mxu1 %v643_v34 }
 0x1d2   :  { %1897 = vmatprep.subr.mxu0 %v645_v35  ;;  %1908 = vmatpush3.msra.mxu1 %v643_v34 }
 0x1d3   :  { %1898 = vmatpush3.msra.mxu0 %v645_v35  ;;  %1909 = vmatprep.subr.mxu1 %v642_v36 }
 0x1d4   :  { %1900 = vmatmul.mubr.msk.f32.vlgmr.msra.gmra.mxu0 %vm432_vm3, %v2187_v28  ;;  %1910 = vmatpush3.msra.mxu1 %v642_v36 }
 0x1d5   :  { %1902 = vmatprep.mubr.msk.f32.mxu0 %vm432_vm3, %v2185_v26  ;;  %1911 = vmatprep.subr.mxu1 %v641_v37 }
 0x1d6   :  { %1912 = vmatpush3.msra.mxu1 %v641_v37 }
 0x1d8   :  { %1903 = vmatmul.mubr.msk.f32.gmra.mxu0 %vm432_vm3, %v2189_v30 }
 0x1d9   :  { %1923 = vmatprep.mubr.msk.f32.mxu0 %vm50_vm0, %v2115_v2 }
 0x28c   :  { %v1883_v38 = vpop.f32.mrf.mxu0 }
 0x28e   :  { %v554_v39 = vpop.f32.mrf.mxu0  ;;  %v1890_v40 = vpop.f32.mrf.mxu1 }
 0x28f   :  { %1913 = vmatprep.mubr.msk.f32.mxu1 %vm432_vm3, %v554_v39 }
 0x290   :  { %v629_v41 = vpop.f32.mrf.mxu1  ;;  %1914 = vmatmul.mubr.msk.f32.vlgmr.msra.gmra.mxu1 %vm432_vm3, %v1883_v38 }
 0x291   :  { %1916 = vmatprep.mubr.msk.f32.mxu1 %vm432_vm3, %v629_v41  ;;  %v639_v41 = vld [vmem:[%s2390_s11 + $0x4] sm:$0x1] }
 0x294   :  { %1917 = vmatmul.mubr.msk.f32.gmra.mxu1 %vm432_vm3, %v1890_v40  ;;  %v1901_v2 = vpop.f32.mrf.mxu0 }
 0x295   :  { %1930 = vmatprep.mubr.msk.f32.mxu1 %vm50_vm0, %v2130_v5 }
 0x296   :  { %v727_v42 = vpop.f32.mrf.mxu0 }
 0x298   :  { %v1904_v47 = vpop.f32.mrf.mxu0 }
 0x29a   :  { %v737_v55 = vpop.f32.mrf.mxu0 }
 0x350   :  { %v1915_v44 = vpop.f32.mrf.mxu1 }
 0x351   :  { %v830_v45 = vadd.f32 %v1915_v44, %v1901_v2 }
 0x352   :  { %v824_v46 = vpop.f32.mrf.mxu1 }
 0x353   :  { %v848_v48 = vadd.f32 %v1732_v43, %v830_v45  ;;  %v825_v49 = vadd.f32 %v824_v46, %v727_v42 }
 0x354   :  { %v1918_v50 = vpop.f32.mrf.mxu1 }
 0x355   :  { %v847_v51 = vadd.f32 %v1732_v43, %v825_v49  ;;  %v840_v52 = vadd.f32 %v1918_v50, %v1904_v47  ;;  %v852_v53 = vmax.f32 %v848_v48, 0.0 }
 0x356   :  { %v834_v54 = vpop.f32.mrf.mxu1 }
 0x357   :  { %v851_v56 = vmax.f32 %v847_v51, 0.0  ;;  %v850_v5 = vadd.f32 %v1732_v43, %v840_v52  ;;  %v835_v57 = vadd.f32 %v834_v54, %v737_v55  ;;  %v870_v59 = vmul.f32 %v852_v53, %v852_v53 }
 0x358   :  { %v856_v63 = vsel %vm432_vm3, %v852_v53, 0.0 }
 0x359   :  { %v869_v58 = vmul.f32 %v851_v56, %v851_v56  ;;  %v855_v60 = vsel %vm432_vm3, %v851_v56, 0.0  ;;  %v854_v61 = vmax.f32 %v850_v5, 0.0  ;;  %v849_v62 = vadd.f32 %v1732_v43, %v835_v57  ;;  %v640_v43 = vld [vmem:[%s2390_s11 + $0x5] sm:$0x1]  ;;  %v1070_v57 = vld [vmem:[%s2386_s7 + $0x18] sm:$0xff] }
 0x35a   :  { %v857_v4 = vadd.f32 %v856_v63, %v855_v60  ;;  %v874_v6 = vsel %vm432_vm3, %v870_v59, 0.0  ;;  %v1067_v59 = vld [vmem:[%s2386_s7] sm:$0xff]  ;;  %v1340_v60 = vld [vmem:[%s2388_s9 + $0x18] sm:$0xff]  ;;  %v1064_v63 = vld [vmem:[%s2385_s6 + $0x8] sm:$0xff] }
 0x35b   :  { %v873_v0 = vsel %vm432_vm3, %v869_v58, 0.0  ;;  %v853_v1 = vmax.f32 %v849_v62, 0.0  ;;  %v872_v8 = vmul.f32 %v854_v61, %v854_v61  ;;  %v860_v13 = vsel %vm432_vm3, %v854_v61, 0.0  ;;  %v1068_v58 = vld [vmem:[%s2386_s7 + $0x8] sm:$0xff]  ;;  %v1337_v62 = vld [vmem:[%s2388_s9] sm:$0xff] }
 0x35c   :  { %v875_v11 = vadd.f32 %v874_v6, %v873_v0  ;;  %v1063_v0 = vld [vmem:[%s2385_s6] sm:$0xff] }
 0x35d   :  { %v858_v9 = vsel %vm432_vm3, %v853_v1, 0.0  ;;  %v871_v10 = vmul.f32 %v853_v1, %v853_v1  ;;  %v878_v18 = vsel %vm432_vm3, %v872_v8, 0.0 }
 0x35e   :  { %v859_v12 = vadd.f32 %v858_v9, %v857_v4 }
 0x35f   :  { %v876_v15 = vsel %vm432_vm3, %v871_v10, 0.0 }
 0x360   :  { %v861_v16 = vadd.f32 %v860_v13, %v859_v12  ;;  %v877_v17 = vadd.f32 %v876_v15, %v875_v11  ;;  %v1335_v13 = vld [vmem:[%s2387_s8 + $0x10] sm:$0xff] }
 0x362   :  { %v862_v19 = vrot.slane %v861_v16, 4  ;;  %v879_v20 = vadd.f32 %v878_v18, %v877_v17  ;;  %v1333_v17 = vld [vmem:[%s2387_s8] sm:$0xff]  ;;  %v1512_v18 = vld [vmem:[%s2389_s10 + $0x8] sm:$0xff] }
 0x364   :  { %v863_v21 = vadd.f32 %v862_v19, %v861_v16  ;;  %v880_v22 = vrot.slane %v879_v20, 4  ;;  %v1334_v16 = vld [vmem:[%s2387_s8 + $0x8] sm:$0xff]  ;;  %v1511_v19 = vld [vmem:[%s2389_s10] sm:$0xff] }
 0x366   :  { %v864_v23 = vrot.slane %v863_v21, 2  ;;  %v881_v24 = vadd.f32 %v880_v22, %v879_v20 }
 0x368   :  { %v865_v25 = vadd.f32 %v864_v23, %v863_v21  ;;  %v882_v27 = vrot.slane %v881_v24, 2 }
 0x36a   :  { %v866_v29 = vrot.slane %v865_v25, 1  ;;  %v883_v32 = vadd.f32 %v882_v27, %v881_v24 }
 0x36c   :  { %v867_v33 = vadd.f32 %v866_v29, %v865_v25  ;;  %v884_v34 = vrot.slane %v883_v32, 1 }
 0x36e   :  { %v868_v35 = vmul.f32 0.03125, %v867_v33  ;;  %v885_v36 = vadd.f32 %v884_v34, %v883_v32 }
 0x370   :  { %v886_v37 = vmul.f32 0.03125, %v885_v36  ;;  %v887_v38 = vmul.f32 %v868_v35, %v868_v35 }
 0x372   :  { %v888_v39 = vsub.f32 %v886_v37, %v887_v38 }
 0x374   :  { %v889_v40 = vadd.f32 1e-05, %v888_v39 }
 0x376   :  { %2008 = vrsqrt.f32 %v889_v40 }
 0x383   :  { %v2009_v2 = vpop.eup %2008 }
 0x384   :  { %v891_v42 = vmul.f32 %v2009_v2, %v639_v41 }
 0x386   :  { %v892_v44 = vmul.f32 %v891_v42, %v868_v35  ;;  %v897_v45 = vrot.slane %v891_v42, %v2178_v14 }
 0x388   :  { %v893_v46 = vsub.f32 %v640_v43, %v892_v44  ;;  %v900_v47 = vmul.f32 %v897_v45, %v853_v1  ;;  %v901_v49 = vmul.f32 %v897_v45, %v854_v61  ;;  %v899_v50 = vmul.f32 %v897_v45, %v852_v53  ;;  %v1069_v53 = vld [vmem:[%s2386_s7 + $0x10] sm:$0xff]  ;;  %v1338_v61 = vld [vmem:[%s2388_s9 + $0x8] sm:$0xff]  ;;  %v1336_v1 = vld [vmem:[%s2387_s8 + $0x18] sm:$0xff]  ;;  %s2037_s7 = smov 80  }
 0x389   :  { %v898_v51 = vmul.f32 %v897_v45, %v851_v56  ;;  %v1066_v56 = vld [vmem:[%s2385_s6 + $0x18] sm:$0xff] }
 0x38a   :  { %v905_v48 = vrot.slane %v893_v46, %v2178_v14 }
 0x38c   :  { %v908_v52 = vadd.f32 %v905_v48, %v900_v47  ;;  %v909_v54 = vadd.f32 %v905_v48, %v901_v49  ;;  %v907_v55 = vadd.f32 %v905_v48, %v899_v50  ;;  %v906_v5 = vadd.f32 %v905_v48, %v898_v51 }
 0x38e   :  { %1926 = vmatprep.subr.mxu1 %v909_v54  ;;  %1638 = vrot.lane.b32.xlu1 %v908_v52, %s2035_s23 }
 0x38f   :  { %1919 = vmatprep.subr.mxu0 %v907_v55  ;;  %1634 = vrot.lane.b32.xlu0 %v906_v5, %s2035_s23 }
 0x390   :  { %1920 = vmatpush3.msra.mxu0 %v907_v55  ;;  %1927 = vmatpush3.msra.mxu1 %v909_v54 }
 0x391   :  { %1921 = vmatprep.subr.mxu0 %v906_v5  ;;  %1928 = vmatprep.subr.mxu1 %v908_v52 }
 0x392   :  { %1922 = vmatpush3.msra.mxu0 %v906_v5  ;;  %1929 = vmatpush3.msra.mxu1 %v908_v52 }
 0x393   :  { %1640 = vrot.lane.b32.xlu1 %v909_v54, %s2035_s23  ;;  %1636 = vrot.lane.b32.xlu0 %v907_v55, %s2035_s23 }
 0x394   :  { %1924 = vmatmul.mubr.msk.f32.vlgmr.msra.gmra.mxu0 %vm50_vm0, %v2122_v3  ;;  %1933 = vmatprep.subr.mxu0 %v1070_v57  ;;  %v1065_v3 = vld [vmem:[%s2385_s6 + $0x10] sm:$0xff] }
 0x395   :  { %1934 = vmatpush3.msra.mxu0 %v1070_v57  ;;  %1941 = vmatprep.mubr.msk.f32.mxu0 %vm432_vm3, %v906_v5 }
 0x396   :  { %1935 = vmatprep.subr.mxu0 %v1069_v53  ;;  %1931 = vmatmul.mubr.msk.f32.vlgmr.msra.gmra.mxu1 %vm50_vm0, %v2142_v7  ;;  %v1339_v7 = vld [vmem:[%s2388_s9 + $0x10] sm:$0xff] }
 0x397   :  { %1936 = vmatpush3.msra.mxu0 %v1069_v53  ;;  %1947 = vmatprep.subr.mxu1 %v1066_v56 }
 0x398   :  { %1937 = vmatprep.subr.mxu0 %v1068_v58  ;;  %1948 = vmatpush3.msra.mxu1 %v1066_v56 }
 0x399   :  { %1938 = vmatpush3.msra.mxu0 %v1068_v58  ;;  %1949 = vmatprep.subr.mxu1 %v1065_v3 }
 0x39a   :  { %1939 = vmatprep.subr.mxu0 %v1067_v59  ;;  %1950 = vmatpush3.msra.mxu1 %v1065_v3 }
 0x39b   :  { %1940 = vmatpush3.msra.mxu0 %v1067_v59  ;;  %1951 = vmatprep.subr.mxu1 %v1064_v63 }
 0x39c   :  { %1942 = vmatmul.mubr.msk.f32.vlgmr.msra.gmra.mxu0 %vm432_vm3, %v907_v55  ;;  %1961 = vmatprep.subr.mxu0 %v1340_v60 }
 0x39d   :  { %1944 = vmatprep.mubr.msk.f32.mxu0 %vm432_vm3, %v908_v52  ;;  %1962 = vmatpush3.msra.mxu0 %v1340_v60 }
 0x39e   :  { %1963 = vmatprep.subr.mxu0 %v1339_v7  ;;  %1952 = vmatpush3.msra.mxu1 %v1064_v63 }
 0x39f   :  { %1964 = vmatpush3.msra.mxu0 %v1339_v7  ;;  %1953 = vmatprep.subr.mxu1 %v1063_v0 }
 0x3a0   :  { %1945 = vmatmul.mubr.msk.f32.gmra.mxu0 %vm432_vm3, %v909_v54  ;;  %1965 = vmatprep.subr.mxu0 %v1338_v61 }
 0x3a1   :  { %1966 = vmatpush3.msra.mxu0 %v1338_v61  ;;  %1969 = vmatprep.mubr.msk.f32.mxu0 %vm432_vm3, %v906_v5 }
 0x3a2   :  { %1967 = vmatprep.subr.mxu0 %v1337_v62  ;;  %1954 = vmatpush3.msra.mxu1 %v1063_v0 }
 0x3a3   :  { %1968 = vmatpush3.msra.mxu0 %v1337_v62  ;;  %1975 = vmatprep.subr.mxu1 %v1336_v1 }
 0x3a4   :  { %1970 = vmatmul.mubr.msk.f32.vlgmr.msra.gmra.mxu0 %vm432_vm3, %v907_v55  ;;  %1989 = vmatprep.subr.mxu0 %v1512_v18 }
 0x3a5   :  { %1972 = vmatprep.mubr.msk.f32.mxu0 %vm432_vm3, %v908_v52  ;;  %1990 = vmatpush3.msra.mxu0 %v1512_v18 }
 0x3a6   :  { %1991 = vmatprep.subr.mxu0 %v1511_v19 }
 0x3a7   :  { %1992 = vmatpush3.msra.mxu0 %v1511_v19 }
 0x3a8   :  { %1973 = vmatmul.mubr.msk.f32.gmra.mxu0 %vm432_vm3, %v909_v54 }
 0x400   :  { %v1639_v4 = vpop.permute.xlu1 %1638 }
 0x401   :  { %1649 = vst.msk [vmem:[#allocation2 + $0x10] sm:$0xff] %vm1646_vm4, %v1639_v4  ;;  %v1635_v6 = vpop.permute.xlu0 %1634 }
 0x402   :  { %1647 = vst.msk [vmem:[#allocation2] sm:$0xff] %vm1646_vm4, %v1635_v6 }
 0x405   :  { %v1641_v8 = vpop.permute.xlu1 %1640  ;;  %v1637_v9 = vpop.permute.xlu0 %1636 }
 0x406   :  { %1650 = vst.msk [vmem:[#allocation2 + $0x18] sm:$0xff] %vm1646_vm4, %v1641_v8  ;;  %1648 = vst.msk [vmem:[#allocation2 + $0x8] sm:$0xff] %vm1646_vm4, %v1637_v9 }
 0x454   :  { %v1925_v10 = vpop.f32.mrf.mxu0 }
 0x456   :  { %v976_v11 = vpop.f32.mrf.mxu0  ;;  %v1932_v12 = vpop.f32.mrf.mxu1 }
 0x457   :  { %1955 = vmatprep.mubr.msk.f32.mxu1 %vm432_vm3, %v976_v11 }
 0x458   :  { %1956 = vmatmul.mubr.msk.f32.vlgmr.msra.gmra.mxu1 %vm432_vm3, %v1925_v10  ;;  %v1051_v15 = vpop.f32.mrf.mxu1 }
 0x459   :  { %1976 = vmatpush3.msra.mxu1 %v1336_v1  ;;  %1958 = vmatprep.mubr.msk.f32.mxu1 %vm432_vm3, %v1051_v15 }
 0x45a   :  { %1977 = vmatprep.subr.mxu1 %v1335_v13 }
 0x45b   :  { %1978 = vmatpush3.msra.mxu1 %v1335_v13 }
 0x45c   :  { %1959 = vmatmul.mubr.msk.f32.gmra.mxu1 %vm432_vm3, %v1932_v12  ;;  %1979 = vmatprep.subr.mxu1 %v1334_v16  ;;  %v1061_v12 = vld [vmem:[%s2390_s11 + $0x7] sm:$0x1] }
 0x45d   :  { %1980 = vmatpush3.msra.mxu1 %v1334_v16  ;;  %1983 = vmatprep.mubr.msk.f32.mxu1 %vm432_vm3, %v2191_v31  ;;  %v1943_v31 = vpop.f32.mrf.mxu0  ;;  %v1062_v16 = vld [vmem:[%s2390_s11 + $0x8] sm:$0x1] }
 0x45e   :  { %1981 = vmatprep.subr.mxu1 %v1333_v17 }
 0x45f   :  { %1982 = vmatpush3.msra.mxu1 %v1333_v17 }
 0x460   :  { %1984 = vmatmul.mubr.msk.f32.vlgmr.msra.gmra.mxu1 %vm432_vm3, %v2187_v28  ;;  %v1149_v28 = vpop.f32.mrf.mxu0 }
 0x461   :  { %1986 = vmatprep.mubr.msk.f32.mxu1 %vm432_vm3, %v2185_v26  ;;  %v1745_v26 = vld [vmem:[%s2390_s11 + $0x6] ss:$0 sm:$0xff] }
 0x462   :  { %v1946_v22 = vpop.f32.mrf.mxu0 }
 0x464   :  { %1987 = vmatmul.mubr.msk.f32.gmra.mxu1 %vm432_vm3, %v2189_v30  ;;  %v1159_v34 = vpop.f32.mrf.mxu0 }
 0x518   :  { %v1957_v20 = vpop.f32.mrf.mxu1 }
 0x519   :  { %v1252_v30 = vadd.f32 %v1957_v20, %v1943_v31 }
 0x51a   :  { %v1246_v21 = vpop.f32.mrf.mxu1 }
 0x51b   :  { %v1270_v23 = vadd.f32 %v1745_v26, %v1252_v30  ;;  %v1247_v24 = vadd.f32 %v1246_v21, %v1149_v28 }
 0x51c   :  { %v1960_v25 = vpop.f32.mrf.mxu1 }
 0x51d   :  { %v1269_v27 = vadd.f32 %v1745_v26, %v1247_v24  ;;  %v1262_v29 = vadd.f32 %v1960_v25, %v1946_v22  ;;  %v1274_v32 = vmax.f32 %v1270_v23, 0.0 }
 0x51e   :  { %v1256_v33 = vpop.f32.mrf.mxu1 }
 0x51f   :  { %v1273_v35 = vmax.f32 %v1269_v27, 0.0  ;;  %v1272_v36 = vadd.f32 %v1745_v26, %v1262_v29  ;;  %v1257_v37 = vadd.f32 %v1256_v33, %v1159_v34  ;;  %v1292_v39 = vmul.f32 %v1274_v32, %v1274_v32 }
 0x520   :  { %v1278_v42 = vsel %vm50_vm0, %v1274_v32, 0.0  ;;  %v1985_v34 = vpop.f32.mrf.mxu1 }
 0x521   :  { %v1291_v38 = vmul.f32 %v1273_v35, %v1273_v35  ;;  %v1277_v40 = vsel %vm50_vm0, %v1273_v35, 0.0  ;;  %v1276_v41 = vmax.f32 %v1272_v36, 0.0  ;;  %v1271_v2 = vadd.f32 %v1745_v26, %v1257_v37 }
 0x522   :  { %v1279_v45 = vadd.f32 %v1278_v42, %v1277_v40  ;;  %v1296_v46 = vsel %vm50_vm0, %v1292_v39, 0.0  ;;  %v1492_v36 = vpop.f32.mrf.mxu1  ;;  %v1758_v40 = vld [vmem:[%s2390_s11 + $0x9] ss:$0 sm:$0xff]  ;;  %s2038_s11 = smov [#allocation2]  }
 0x523   :  { %v1295_v43 = vsel %vm50_vm0, %v1291_v38, 0.0  ;;  %v1275_v44 = vmax.f32 %v1271_v2, 0.0  ;;  %v1294_v47 = vmul.f32 %v1276_v41, %v1276_v41  ;;  %v1282_v52 = vsel %vm50_vm0, %v1276_v41, 0.0  ;;  %s1694_s20 = sshll.u32 %s2038_s11, 4  ;;  %s1695_s20 = int_to_ptr.vmem [resolvable:$true] %s1694_s20 }
 0x524   :  { %v1297_v50 = vadd.f32 %v1296_v46, %v1295_v43  ;;  %v1988_v38 = vpop.f32.mrf.mxu1  ;;  %s2012_s4 = scalar_lea.vmem %s1695_s20, 512  ;;  %p2017_p1 = scmp.lt.s32.totalorder %s1695_s20, %s1695_s20 }
 0x525   :  { %v1280_v48 = vsel %vm50_vm0, %v1275_v44, 0.0  ;;  %v1293_v49 = vmul.f32 %v1275_v44, %v1275_v44  ;;  %v1300_v57 = vsel %vm50_vm0, %v1294_v47, 0.0  ;;  %p2013_p0 = scmp.ne.s32.totalorder %s1695_s20, %s2012_s4  ;;  %p2018_p2 = scmp.lt.s32.totalorder %s2012_s4, %s2012_s4 }
 0x526   :  { %v1281_v51 = vadd.f32 %v1280_v48, %v1279_v45  ;;  %v1502_v43 = vpop.f32.mrf.mxu1 }
 0x527   :  { %v1298_v54 = vsel %vm50_vm0, %v1293_v49, 0.0  ;;  %p2019_p3 = por %p2018_p2, %p2017_p1 }
 0x528   :  { %v1283_v55 = vadd.f32 %v1282_v52, %v1281_v51  ;;  %v1299_v5 = vadd.f32 %v1298_v54, %v1297_v50 }
 0x529   :  { %p2020_p4 = pnand %p2019_p3, %p2013_p0 }
 0x52a   :  { %v1284_v53 = vrot.slane %v1283_v55, 4  ;;  %v1301_v56 = vadd.f32 %v1300_v57, %v1299_v5 }
 0x52c   :  { %v1285_v58 = vadd.f32 %v1284_v53, %v1283_v55  ;;  %v1302_v3 = vrot.slane %v1301_v56, 4 }
 0x52e   :  { %v1286_v59 = vrot.slane %v1285_v58, 2  ;;  %v1303_v60 = vadd.f32 %v1302_v3, %v1301_v56 }
 0x530   :  { %v1287_v7 = vadd.f32 %v1286_v59, %v1285_v58  ;;  %v1304_v61 = vrot.slane %v1303_v60, 2 }
 0x532   :  { %v1288_v62 = vrot.slane %v1287_v7, 1  ;;  %v1305_v63 = vadd.f32 %v1304_v61, %v1303_v60 }
 0x534   :  { %v1289_v0 = vadd.f32 %v1288_v62, %v1287_v7  ;;  %v1306_v1 = vrot.slane %v1305_v63, 1 }
 0x536   :  { %v1290_v4 = vmul.f32 0.03125, %v1289_v0  ;;  %v1307_v6 = vadd.f32 %v1306_v1, %v1305_v63 }
 0x538   :  { %v1308_v8 = vmul.f32 0.03125, %v1307_v6  ;;  %v1309_v9 = vmul.f32 %v1290_v4, %v1290_v4 }
 0x53a   :  { %v1310_v10 = vsub.f32 %v1308_v8, %v1309_v9 }
 0x53c   :  { %v1311_v11 = vadd.f32 1e-05, %v1310_v10 }
 0x53e   :  { %2010 = vrsqrt.f32 %v1311_v11 }
 0x54b   :  { %v2011_v13 = vpop.eup %2010 }
 0x54c   :  { %v1313_v15 = vmul.f32 %v2011_v13, %v1061_v12 }
 0x54e   :  { %v1319_v17 = vrot.slane %v1313_v15, %v2178_v14  ;;  %v1314_v18 = vmul.f32 %v1313_v15, %v1290_v4 }
 0x550   :  { %v1315_v19 = vsub.f32 %v1062_v16, %v1314_v18  ;;  %v1321_v31 = vmul.f32 %v1319_v17, %v1274_v32  ;;  %v1320_v26 = vmul.f32 %v1319_v17, %v1273_v35  ;;  %v1322_v21 = vmul.f32 %v1319_v17, %v1275_v44  ;;  %v1971_v32 = vpop.f32.mrf.mxu0 }
 0x551   :  { %v1323_v22 = vmul.f32 %v1319_v17, %v1276_v41  ;;  %v1498_v39 = vadd.f32 %v1985_v34, %v1971_v32 }
 0x552   :  { %v1327_v28 = vrot.slane %v1315_v19, %v2178_v14  ;;  %v1407_v33 = vpop.f32.mrf.mxu0 }
 0x553   :  { %v1493_v2 = vadd.f32 %v1492_v36, %v1407_v33 }
 0x554   :  { %v1329_v20 = vadd.f32 %v1327_v28, %v1321_v31  ;;  %v1328_v30 = vadd.f32 %v1327_v28, %v1320_v26  ;;  %v1330_v23 = vadd.f32 %v1327_v28, %v1322_v21  ;;  %v1331_v24 = vadd.f32 %v1327_v28, %v1323_v22  ;;  %v1974_v35 = vpop.f32.mrf.mxu0 }
 0x555   :  { %v1508_v45 = vadd.f32 %v1988_v38, %v1974_v35 }
 0x556   :  { %1653 = vrot.lane.b32.xlu1 %v1329_v20, %s2036_s5  ;;  %1651 = vrot.lane.b32.xlu0 %v1328_v30, %s2036_s5  ;;  %v1417_v37 = vpop.f32.mrf.mxu0 }
 0x557   :  { %1993 = vmatprep.mubr.msk.f32.mxu0 %vm50_vm0, %v1328_v30  ;;  %v1503_v49 = vadd.f32 %v1502_v43, %v1417_v37 }
 0x558   :  { %1994 = vmatmul.mubr.msk.f32.vlgmr.msra.gmra.mxu0 %vm50_vm0, %v1329_v20 }
 0x559   :  { %1996 = vmatprep.mubr.msk.f32.mxu0 %vm50_vm0, %v1330_v23 }
 0x55a   :  { %1657 = vrot.lane.b32.xlu1 %v1331_v24, %s2036_s5  ;;  %1655 = vrot.lane.b32.xlu0 %v1330_v23, %s2036_s5 }
 0x55c   :  { %1997 = vmatmul.mubr.msk.f32.gmra.mxu0 %vm50_vm0, %v1331_v24 }
 0x5c8   :  { %v1654_v14 = vpop.permute.xlu1 %1653  ;;  %v1652_v25 = vpop.permute.xlu0 %1651 }
 0x5c9   :  { %1665 = vst.msk [vmem:[#allocation2 + $0x8] sm:$0xff] %vm1663_vm5, %v1654_v14  ;;  %1664 = vst.msk [vmem:[#allocation2] sm:$0xff] %vm1663_vm5, %v1652_v25 }
 0x5cc   :  { %v1658_v27 = vpop.permute.xlu1 %1657  ;;  %v1656_v29 = vpop.permute.xlu0 %1655 }
 0x5cd   :  { %1667 = vst.msk [vmem:[#allocation2 + $0x18] sm:$0xff] %vm1663_vm5, %v1658_v27  ;;  %1666 = vst.msk [vmem:[#allocation2 + $0x10] sm:$0xff] %vm1663_vm5, %v1656_v29 }
 0x618   :  { %v1995_v41 = vpop.f32.mrf.mxu0 }
 0x619   :  { %v1611_v42 = vadd.f32 %v1995_v41, %v1498_v39 }
 0x61a   :  { %v1591_v44 = vpop.f32.mrf.mxu0 }
 0x61b   :  { %v1619_v46 = vadd.f32 %v1758_v40, %v1611_v42  ;;  %v1610_v47 = vadd.f32 %v1591_v44, %v1493_v2 }
 0x61c   :  { %v1998_v48 = vpop.f32.mrf.mxu0 }
 0x61d   :  { %v1623_v50 = vmax.f32 %v1619_v46, 0.0  ;;  %v1618_v51 = vadd.f32 %v1758_v40, %v1610_v47  ;;  %v1613_v52 = vadd.f32 %v1998_v48, %v1508_v45 }
 0x61e   :  { %v1601_v54 = vpop.f32.mrf.mxu0 }
 0x61f   :  { %v1622_v55 = vmax.f32 %v1618_v51, 0.0  ;;  %v1621_v5 = vadd.f32 %v1758_v40, %v1613_v52  ;;  %v1612_v57 = vadd.f32 %v1601_v54, %v1503_v49  ;;  %1674 = vrot.lane.b32.xlu1 %v1623_v50, %s2037_s7 }
 0x621   :  { %v1625_v53 = vmax.f32 %v1621_v5, 0.0  ;;  %v1620_v56 = vadd.f32 %v1758_v40, %v1612_v57  ;;  %1672 = vrot.lane.b32.xlu0 %v1622_v55, %s2037_s7 }
 0x623   :  { %v1624_v58 = vmax.f32 %v1620_v56, 0.0  ;;  %1678 = vrot.lane.b32.xlu1 %v1625_v53, %s2037_s7 }
 0x625   :  { %1676 = vrot.lane.b32.xlu0 %v1624_v58, %s2037_s7 }
 0x691   :  { %v1675_v3 = vpop.permute.xlu1 %1674 }
 0x692   :  { %1686 = vst.msk [vmem:[#allocation2 + $0x8] sm:$0xff] %vm1684_vm6, %v1675_v3 }
 0x693   :  { %v1673_v59 = vpop.permute.xlu0 %1672 }
 0x694   :  { %1685 = vst.msk [vmem:[#allocation2] sm:$0xff] %vm1684_vm6, %v1673_v59 }
 0x695   :  { %v1679_v60 = vpop.permute.xlu1 %1678 }
 0x696   :  { %1688 = vst.msk [vmem:[#allocation2 + $0x18] sm:$0xff] %vm1684_vm6, %v1679_v60 }
 0x697   :  { %v1677_v7 = vpop.permute.xlu0 %1676 }
 0x698   :  { %1687 = vst.msk [vmem:[#allocation2 + $0x10] sm:$0xff] %vm1684_vm6, %v1677_v7 }
 0x699   :  { %2023 = shalt.err (!%p2020_p4)
}
 0x69a   :  { %s2039_s21 = smov 128   ;;  %s2040_s1 = smov 8  }
 0x69b   :  { %1700 = dma.vmem_to_hbm [thread:$0]  %s1695_s20, 512, %s2391_s12, [#allocation3], %s2039_s21, %s2039_s21, %s2040_s1  }
 0x69c   :  { %2032 = dma.done.wait [#allocation3], 512  }
 0x69d   :  { %2033 = vsyncadd [#allocation3], 4294966784 }
 0x69e   :  { %1704 = vsyncpa [#allocation3], 1 }

</bundles_post_ra>
